<compile_context>
chip_gen: v7x
topology: tpu7x:2x2x1
jax: 0.10.0
libtpu: 0.0.40
codegen_flags: <defaults>
</compile_context>

<pallas_src>
import functools

import jax
import jax.numpy as jnp
from jax import lax
from jax.experimental import pallas as pl
from jax.experimental.pallas import tpu as pltpu


def _round_up(x, m):
    return ((x + m - 1) // m) * m


def _pick_tb_cap(D, itemsize, budget_bytes=8 << 20, max_rows=2048):
    """Largest batch tile whose double-buffered input streams fit the budget."""
    per_row = 3 * 2 * D * itemsize          # 3 streams x 2 pipeline buffers
    cap = budget_bytes // max(per_row, 1)
    cap = min(max_rows, cap)
    return max(8, (cap // 8) * 8)


def _contrastive_kernel(a_ref, p_ref, n_ref, out_ref, acc_ref, *,
                        margin, scale, tb, steps, b_real, need_mask):
    """loss_weight=None path: no weight stream, no multiply."""
    j = pl.program_id(1)

    @pl.when(j == 0)
    def _():
        acc_ref[...] = jnp.zeros_like(acc_ref)

    a = a_ref[...].astype(jnp.float32)
    p = p_ref[...].astype(jnp.float32)
    n = n_ref[...].astype(jnp.float32)

    dpos = a - p
    dneg = a - n
    dp = jnp.sum(dpos * dpos, axis=1, keepdims=True)   # (tb, 1)
    dn = jnp.sum(dneg * dneg, axis=1, keepdims=True)   # (tb, 1)
    losses = jnp.maximum(dp - dn + margin, 0.0)

    if need_mask:  # zero out padded batch rows (they'd otherwise add margin)
        row0 = (pl.program_id(0) * steps + j) * tb
        rows = row0 + lax.broadcasted_iota(jnp.int32, (tb, 1), 0)
        losses = jnp.where(rows < b_real, losses, 0.0)

    acc_ref[...] = acc_ref[...] + losses

    @pl.when(j == steps - 1)
    def _():
        total = jnp.sum(acc_ref[...], axis=0, keepdims=True)   # (1, 1)
        out_ref[...] = (total * scale).reshape(1, 1, 1)


def _contrastive_kernel_weighted(a_ref, p_ref, n_ref, w_ref, out_ref, acc_ref,
                                 *, margin, scale, steps):
    """loss_weight path: padded rows carry weight 0, so they contribute 0."""
    j = pl.program_id(1)

    @pl.when(j == 0)
    def _():
        acc_ref[...] = jnp.zeros_like(acc_ref)

    a = a_ref[...].astype(jnp.float32)
    p = p_ref[...].astype(jnp.float32)
    n = n_ref[...].astype(jnp.float32)

    dpos = a - p
    dneg = a - n
    dp = jnp.sum(dpos * dpos, axis=1, keepdims=True)   # (tb, 1)
    dn = jnp.sum(dneg * dneg, axis=1, keepdims=True)   # (tb, 1)
    losses = jnp.maximum((dp - dn + margin) * w_ref[...], 0.0)

    acc_ref[...] = acc_ref[...] + losses

    @pl.when(j == steps - 1)
    def _():
        total = jnp.sum(acc_ref[...], axis=0, keepdims=True)   # (1, 1)
        out_ref[...] = (total * scale).reshape(1, 1, 1)


def contrastive_loss(anchor, positive, negative, *, margin=10.0,
                     size_average=True, loss_weight=None, tb=None):
    """Pallas implementation of ContrastiveLoss.forward."""
    anchor = jnp.asarray(anchor)
    positive = jnp.asarray(positive)
    negative = jnp.asarray(negative)
    B, D = anchor.shape

    itemsize = jnp.dtype(anchor.dtype).itemsize
    cap = _pick_tb_cap(D, itemsize) if tb is None else max(8, (int(tb) // 8) * 8)

    # Spread the batch evenly over the minimal number of tiles respecting the
    # VMEM cap; with >= 2 tiles, emit two "parallel" partials (v7x has 2 TCs).
    n_tiles = max(1, -(-B // cap))
    ncore = 2 if n_tiles >= 2 else 1
    n_tiles = _round_up(n_tiles, ncore)
    tb_eff = _round_up(-(-B // n_tiles), 8)
    steps = n_tiles // ncore
    b_pad = n_tiles * tb_eff
    pad = b_pad - B

    if pad:
        zp = ((0, pad), (0, 0))
        anchor = jnp.pad(anchor, zp)
        positive = jnp.pad(positive, zp)
        negative = jnp.pad(negative, zp)

    scale = (1.0 / B) if size_average else 1.0

    def in_map(c, j):
        return (c * steps + j, 0)

    feat_spec = pl.BlockSpec((tb_eff, D), in_map)

    if loss_weight is None:
        kernel = functools.partial(
            _contrastive_kernel, margin=float(margin), scale=float(scale),
            tb=tb_eff, steps=steps, b_real=B, need_mask=(pad != 0))
        in_specs = [feat_spec, feat_spec, feat_spec]
        args = (anchor, positive, negative)
    else:
        w = jnp.asarray(loss_weight, jnp.float32).reshape(B, 1)
        if pad:
            w = jnp.pad(w, ((0, pad), (0, 0)))   # zero weight => zero loss
        kernel = functools.partial(
            _contrastive_kernel_weighted, margin=float(margin),
            scale=float(scale), steps=steps)
        in_specs = [feat_spec, feat_spec, feat_spec,
                    pl.BlockSpec((tb_eff, 1), in_map)]
        args = (anchor, positive, negative, w)

    partials = pl.pallas_call(
        kernel,
        out_shape=jax.ShapeDtypeStruct((ncore, 1, 1), jnp.float32),
        grid_spec=pltpu.PrefetchScalarGridSpec(
            num_scalar_prefetch=0,
            grid=(ncore, steps),
            in_specs=in_specs,
            out_specs=pl.BlockSpec((1, 1, 1), lambda c, j: (c, 0, 0)),
            scratch_shapes=[pltpu.VMEM((tb_eff, 1), jnp.float32)],
        ),
        compiler_params=pltpu.CompilerParams(
            dimension_semantics=("parallel", "arbitrary"),
            vmem_limit_bytes=32 * 1024 * 1024),
    )(*args)
    return jnp.sum(partials)


def _reference(anchor, positive, negative, margin=10.0, size_average=True,
               loss_weight=None):
    anchor = jnp.asarray(anchor, jnp.float32)
    positive = jnp.asarray(positive, jnp.float32)
    negative = jnp.asarray(negative, jnp.float32)
    dp = jnp.sum((anchor - positive) ** 2, axis=1)
    dn = jnp.sum((anchor - negative) ** 2, axis=1)
    if loss_weight is None:
        losses = jax.nn.relu(dp - dn + margin)
    else:
        w = jnp.asarray(loss_weight, jnp.float32)
        losses = jax.nn.relu((dp - dn + margin) * w)
    return losses.mean() if size_average else losses.sum()


if __name__ == "__main__":
    key = jax.random.PRNGKey(0)
    ka, kp, kn, kw, ka2, kp2, kn2, kw2 = jax.random.split(key, 8)

    # Case 1: small triplet batch, default (mean, unweighted) and weighted-sum.
    B, D = 8, 128
    anchor = jax.random.normal(ka, (B, D), jnp.float32)
    positive = jax.random.normal(kp, (B, D), jnp.float32)
    negative = jax.random.normal(kn, (B, D), jnp.float32)
    weight = jax.random.uniform(kw, (B,), jnp.float32)

    out = contrastive_loss(anchor, positive, negative, margin=10.0)
    jax.block_until_ready(out)
    ref = _reference(anchor, positive, negative, margin=10.0)
    assert jnp.allclose(out, ref, rtol=1e-5, atol=1e-5), (out, ref)

    out_w = contrastive_loss(anchor, positive, negative, margin=10.0,
                             size_average=False, loss_weight=weight)
    jax.block_until_ready(out_w)
    ref_w = _reference(anchor, positive, negative, margin=10.0,
                       size_average=False, loss_weight=weight)
    assert jnp.allclose(out_w, ref_w, rtol=1e-5, atol=1e-5), (out_w, ref_w)

    # Case 2: bf16 inputs streamed in native dtype, batch not divisible by the
    # tile.  tb=128 forces padding + iota masking + the two-partial path.
    B2, D2 = 300, 128
    a2 = jax.random.normal(ka2, (B2, D2), jnp.bfloat16)
    p2 = jax.random.normal(kp2, (B2, D2), jnp.bfloat16)
    n2 = jax.random.normal(kn2, (B2, D2), jnp.bfloat16)
    w2 = jax.random.uniform(kw2, (B2,), jnp.float32)

    out2 = contrastive_loss(a2, p2, n2, margin=10.0, tb=128)
    jax.block_until_ready(out2)
    ref2 = _reference(a2, p2, n2, margin=10.0)
    assert jnp.allclose(out2, ref2, rtol=1e-5, atol=1e-3), (out2, ref2)

    out2_auto = contrastive_loss(a2, p2, n2, margin=10.0, size_average=False)
    jax.block_until_ready(out2_auto)
    ref2_sum = _reference(a2, p2, n2, margin=10.0, size_average=False)
    assert jnp.allclose(out2_auto, ref2_sum, rtol=1e-5, atol=1e-2), (out2_auto, ref2_sum)

    out2_w = contrastive_loss(a2, p2, n2, margin=5.0, size_average=False,
                              loss_weight=w2, tb=128)
    jax.block_until_ready(out2_w)
    ref2_w = _reference(a2, p2, n2, margin=5.0, size_average=False,
                        loss_weight=w2)
    assert jnp.allclose(out2_w, ref2_w, rtol=1e-5, atol=1e-2), (out2_w, ref2_w)

    print("KERNEL_OK")
</pallas_src>

<mosaic_0001>
module attributes {stable_mosaic.version = 11 : i64} {
  func.func @_contrastive_kernel(%arg0: i32, %arg1: i32, %arg2: memref<8x128xf32, #tpu.memory_space<vmem>>, %arg3: memref<8x128xf32, #tpu.memory_space<vmem>>, %arg4: memref<8x128xf32, #tpu.memory_space<vmem>>, %arg5: memref<1x1x1xf32, #tpu.memory_space<vmem>>, %arg6: memref<8x1xf32, #tpu.memory_space<vmem>>) attributes {dimension_semantics = [#tpu.dimension_semantics<parallel>, #tpu.dimension_semantics<arbitrary>], iteration_bounds = array<i64: 1, 1>, scalar_prefetch = 0 : i64, scratch_operands = 1 : i64, tpu.core_type = #tpu.core_type<tc>, window_params = [{transform_indices = @transform_0, window_bounds = array<i64: 8, 128>}, {transform_indices = @transform_1, window_bounds = array<i64: 8, 128>}, {transform_indices = @transform_2, window_bounds = array<i64: 8, 128>}, {transform_indices = @transform_3, window_bounds = array<i64: 1, 1, 1>}]} {
    %c0_i32 = arith.constant 0 : i32
    %0 = arith.cmpi eq, %arg1, %c0_i32 : i32
    %1 = arith.extui %0 : i1 to i32
    %c0_i32_0 = arith.constant 0 : i32
    %2 = arith.cmpi ne, %1, %c0_i32_0 : i32
    scf.if %2 {
      %cst_15 = arith.constant 0.000000e+00 : f32
      %25 = vector.broadcast %cst_15 : f32 to vector<8x1xf32>
      %c0_16 = arith.constant 0 : index
      %c0_17 = arith.constant 0 : index
      %26 = vector.load %arg6[%c0_16, %c0_17] : memref<8x1xf32, #tpu.memory_space<vmem>>, vector<8x1xf32>
      tpu.vector_store %arg6[%c0_16, %c0_17], %25 {strides = array<i32>} : memref<8x1xf32, #tpu.memory_space<vmem>>, vector<8x1xf32>,
    } else {
    }
    %c0 = arith.constant 0 : index
    %c0_1 = arith.constant 0 : index
    %3 = vector.load %arg2[%c0, %c0_1] : memref<8x128xf32, #tpu.memory_space<vmem>>, vector<8x128xf32>
    %c0_2 = arith.constant 0 : index
    %c0_3 = arith.constant 0 : index
    %4 = vector.load %arg3[%c0_2, %c0_3] : memref<8x128xf32, #tpu.memory_space<vmem>>, vector<8x128xf32>
    %c0_4 = arith.constant 0 : index
    %c0_5 = arith.constant 0 : index
    %5 = vector.load %arg4[%c0_4, %c0_5] : memref<8x128xf32, #tpu.memory_space<vmem>>, vector<8x128xf32>
    %6 = arith.subf %3, %4 : vector<8x128xf32>
    %7 = arith.subf %3, %5 : vector<8x128xf32>
    %8 = arith.mulf %6, %6 : vector<8x128xf32>
    %cst = arith.constant dense<0.000000e+00> : vector<8xf32>
    %9 = vector.multi_reduction <add>, %8, %cst [1] : vector<8x128xf32> to vector<8xf32>
    %10 = vector.shape_cast %9 : vector<8xf32> to vector<8x1xf32>
    %11 = arith.mulf %7, %7 : vector<8x128xf32>
    %cst_6 = arith.constant dense<0.000000e+00> : vector<8xf32>
    %12 = vector.multi_reduction <add>, %11, %cst_6 [1] : vector<8x128xf32> to vector<8xf32>
    %13 = vector.shape_cast %12 : vector<8xf32> to vector<8x1xf32>
    %14 = arith.subf %10, %13 : vector<8x1xf32>
    %cst_7 = arith.constant 1.000000e+01 : f32
    %15 = vector.broadcast %cst_7 : f32 to vector<8x1xf32>
    %16 = arith.addf %14, %15 : vector<8x1xf32>
    %cst_8 = arith.constant 0.000000e+00 : f32
    %17 = vector.broadcast %cst_8 : f32 to vector<8x1xf32>
    %18 = arith.maximumf %16, %17 : vector<8x1xf32>
    %c0_9 = arith.constant 0 : index
    %c0_10 = arith.constant 0 : index
    %19 = vector.load %arg6[%c0_9, %c0_10] : memref<8x1xf32, #tpu.memory_space<vmem>>, vector<8x1xf32>
    %20 = arith.addf %19, %18 : vector<8x1xf32>
    %c0_11 = arith.constant 0 : index
    %c0_12 = arith.constant 0 : index
    %21 = vector.load %arg6[%c0_11, %c0_12] : memref<8x1xf32, #tpu.memory_space<vmem>>, vector<8x1xf32>
    tpu.vector_store %arg6[%c0_11, %c0_12], %20 {strides = array<i32>} : memref<8x1xf32, #tpu.memory_space<vmem>>, vector<8x1xf32>,
    %c0_i32_13 = arith.constant 0 : i32
    %22 = arith.cmpi eq, %arg1, %c0_i32_13 : i32
    %23 = arith.extui %22 : i1 to i32
    %c0_i32_14 = arith.constant 0 : i32
    %24 = arith.cmpi ne, %23, %c0_i32_14 : i32
    scf.if %24 {
      %c0_15 = arith.constant 0 : index
      %c0_16 = arith.constant 0 : index
      %25 = vector.load %arg6[%c0_15, %c0_16] : memref<8x1xf32, #tpu.memory_space<vmem>>, vector<8x1xf32>
      %cst_17 = arith.constant dense<0.000000e+00> : vector<1xf32>
      %26 = vector.multi_reduction <add>, %25, %cst_17 [0] : vector<8x1xf32> to vector<1xf32>
      %27 = vector.shape_cast %26 : vector<1xf32> to vector<1x1xf32>
      %cst_18 = arith.constant 1.250000e-01 : f32
      %28 = vector.broadcast %cst_18 : f32 to vector<1x1xf32>
      %29 = arith.mulf %27, %28 : vector<1x1xf32>
      %30 = vector.shape_cast %29 : vector<1x1xf32> to vector<1x1x1xf32>
      %c0_19 = arith.constant 0 : index
      %c0_20 = arith.constant 0 : index
      %c0_21 = arith.constant 0 : index
      %31 = vector.load %arg5[%c0_19, %c0_20, %c0_21] : memref<1x1x1xf32, #tpu.memory_space<vmem>>, vector<1x1x1xf32>
      tpu.vector_store %arg5[%c0_19, %c0_20, %c0_21], %30 {strides = array<i32>} : memref<1x1x1xf32, #tpu.memory_space<vmem>>, vector<1x1x1xf32>,
    } else {
    }
    return
  }
  func.func @transform_0(%arg0: i32, %arg1: i32) -> (i32, i32) {
    %c1_i32 = arith.constant 1 : i32
    %0 = arith.muli %arg0, %c1_i32 : i32
    %1 = arith.addi %0, %arg1 : i32
    %c0_i32 = arith.constant 0 : i32
    %c0_i32_0 = arith.constant 0 : i32
    return %1, %c0_i32 : i32, i32
  }
  func.func @transform_1(%arg0: i32, %arg1: i32) -> (i32, i32) {
    %c1_i32 = arith.constant 1 : i32
    %0 = arith.muli %arg0, %c1_i32 : i32
    %1 = arith.addi %0, %arg1 : i32
    %c0_i32 = arith.constant 0 : i32
    %c0_i32_0 = arith.constant 0 : i32
    return %1, %c0_i32 : i32, i32
  }
  func.func @transform_2(%arg0: i32, %arg1: i32) -> (i32, i32) {
    %c1_i32 = arith.constant 1 : i32
    %0 = arith.muli %arg0, %c1_i32 : i32
    %1 = arith.addi %0, %arg1 : i32
    %c0_i32 = arith.constant 0 : i32
    %c0_i32_0 = arith.constant 0 : i32
    return %1, %c0_i32 : i32, i32
  }
  func.func @transform_3(%arg0: i32, %arg1: i32) -> (i32, i32, i32) {
    %c0_i32 = arith.constant 0 : i32
    %c0_i32_0 = arith.constant 0 : i32
    %c0_i32_1 = arith.constant 0 : i32
    return %arg0, %c0_i32, %c0_i32_0 : i32, i32, i32
  }
}

</mosaic_0001>

<bundles_post_ra>
// kernel: tpu_custom_call.1
= control target key start
LH: loop header
LB: loop body
LE: loop exit
PB: predicated region body
PF: predicated region fallthrough
CT: control target
= control target key end

     0   :  { %8 = vsyncpa [#allocation4], 0  ;;  %s288_s0 = inlined_call_operand.hbm [shape: f32[8,128], index: 0, kind: input, shape index: {}]   ;;  %s289_s1 = inlined_call_operand.hbm [shape: f32[8,128], index: 1, kind: input, shape index: {}]   ;;  %s290_s2 = inlined_call_operand.hbm [shape: f32[8,128], index: 2, kind: input, shape index: {}]   ;;  %s291_s3 = inlined_call_operand.hbm [shape: f32[1,1,1], index: 3, kind: output, shape index: {}]  }
   0x1   :  { %9 = vsyncpa [#allocation7], 0 }
   0x2   :  { %10 = vsyncpa [#allocation5], 0  ;;  %s215_s12 = smov [#allocation6]   ;;  %s216_s14 = smov [#allocation3]  }
   0x3   :  { %s33_s13 = sshll.u32 %s215_s12, 4  ;;  %s20_s15 = sshll.u32 %s216_s14, 4  ;;  %s34_s13 = int_to_ptr.vmem [resolvable:$true] %s33_s13  ;;  %s21_s15 = int_to_ptr.vmem [resolvable:$true] %s20_s15 }
   0x4   :  { %s121_s18 = scalar_lea.hbm %s289_s1, 128 }
   0x5   :  { %p122_p0 = scmp.ne.s32.totalorder %s289_s1, %s121_s18  ;;  %p125_p1 = scmp.lt.u32.totalorder %s121_s18, %s289_s1 }
   0x7   :  { %p127_p2 = pnand %p125_p1, %p122_p0 }
   0x9   :  { %130 = shalt.err (!%p127_p2)
}
   0xa   :  { %s131_s23 = scalar_lea.vmem %s34_s13, 128  ;;  %p136_p4 = scmp.lt.s32.totalorder %s34_s13, %s34_s13 }
   0xb   :  { %p132_p3 = scmp.ne.s32.totalorder %s34_s13, %s131_s23  ;;  %p137_p5 = scmp.lt.s32.totalorder %s131_s23, %s131_s23 }
   0xd   :  { %p138_p6 = por %p137_p5, %p136_p4 }
   0xf   :  { %p139_p7 = pnand %p138_p6, %p132_p3 }
  0x11   :  { %142 = shalt.err (!%p139_p7)
}
  0x12   :  { %36 = dma.hbm_to_vmem [thread:$0]  %s289_s1, 128, %s34_s13, [#allocation7]  }
  0x13   :  { %s143_s28 = scalar_lea.hbm %s288_s0, 128 }
  0x14   :  { %p144_p8 = scmp.ne.s32.totalorder %s288_s0, %s143_s28  ;;  %p147_p9 = scmp.lt.u32.totalorder %s143_s28, %s288_s0 }
  0x16   :  { %p149_p10 = pnand %p147_p9, %p144_p8 }
  0x18   :  { %152 = shalt.err (!%p149_p10)
}
  0x19   :  { %s153_s6 = scalar_lea.vmem %s21_s15, 128  ;;  %p158_p12 = scmp.lt.s32.totalorder %s21_s15, %s21_s15 }
  0x1a   :  { %p154_p11 = scmp.ne.s32.totalorder %s21_s15, %s153_s6  ;;  %p159_p13 = scmp.lt.s32.totalorder %s153_s6, %s153_s6 }
  0x1c   :  { %p160_p0 = por %p159_p13, %p158_p12 }
  0x1e   :  { %p161_p1 = pnand %p160_p0, %p154_p11 }
  0x20   :  { %164 = shalt.err (!%p161_p1)
}
  0x21   :  { %23 = dma.hbm_to_vmem [thread:$0]  %s288_s0, 128, %s21_s15, [#allocation4]  }
  0x22   :  { %s217_s8 = smov [#allocation8]   ;;  %s165_s12 = scalar_lea.hbm %s290_s2, 128 }
  0x23   :  { %s46_s9 = sshll.u32 %s217_s8, 4  ;;  %p166_p2 = scmp.ne.s32.totalorder %s290_s2, %s165_s12  ;;  %s47_s9 = int_to_ptr.vmem [resolvable:$true] %s46_s9 }
  0x24   :  { %p169_p3 = scmp.lt.u32.totalorder %s165_s12, %s290_s2 }
  0x26   :  { %p171_p4 = pnand %p169_p3, %p166_p2 }
  0x28   :  { %174 = shalt.err (!%p171_p4)
}
  0x29   :  { %s175_s18 = scalar_lea.vmem %s47_s9, 128  ;;  %p180_p6 = scmp.lt.s32.totalorder %s47_s9, %s47_s9 }
  0x2a   :  { %p176_p5 = scmp.ne.s32.totalorder %s47_s9, %s175_s18  ;;  %p181_p7 = scmp.lt.s32.totalorder %s175_s18, %s175_s18 }
  0x2c   :  { %p182_p8 = por %p181_p7, %p180_p6 }
  0x2e   :  { %p183_p9 = pnand %p182_p8, %p176_p5 }
  0x30   :  { %186 = shalt.err (!%p183_p9)
}
  0x31   :  { %49 = dma.hbm_to_vmem [thread:$0]  %s290_s2, 128, %s47_s9, [#allocation7]  }
  0x32   :  { %209 = dma.done.wait [#allocation4], 128  }
  0x33   :  { %210 = vsyncadd [#allocation4], 4294967168 }
  0x34   :  { %211 = dma.done.wait [#allocation7], 256  }
  0x35   :  { %212 = vsyncadd [#allocation7], 4294967040  ;;  %v68_v0 = vld [vmem:[#allocation3] sm:$0xff]  ;;  %v69_v1 = vld [vmem:[#allocation6] sm:$0xff]  ;;  %vm66_vm0 = vcmask 7168   ;;  %v218_v7 = vmov 0.0  }
  0x36   :  { %v70_v2 = vld [vmem:[#allocation8] sm:$0xff]  ;;  %v71_v3 = vsub.f32 %v68_v0, %v69_v1  ;;  %67 = vst.msk [vmem:[#allocation2] sm:$0xff] %vm66_vm0, %v218_v7  ;;  %s219_s2 = smov [#allocation9]   ;;  %vm98_vm1 = vcmask 0  }
  0x37   :  { %v72_v4 = vsub.f32 %v68_v0, %v70_v2  ;;  %s106_s19 = sshll.u32 %s219_s2, 4  ;;  %s107_s19 = int_to_ptr.vmem [resolvable:$true] %s106_s19 }
  0x38   :  { %v73_v5 = vmul.f32 %v71_v3, %v71_v3  ;;  %s187_s20 = scalar_lea.vmem %s107_s19, 16  ;;  %s191_s21 = scalar_lea.vmem %s107_s19, 32 }
  0x39   :  { %v76_v6 = vmul.f32 %v72_v4, %v72_v4  ;;  %p188_p10 = scmp.ne.s32.totalorder %s107_s19, %s187_s20  ;;  %p192_p11 = scmp.lt.s32.totalorder %s107_s19, %s107_s19 }
  0x3a   :  { %74 = vadd.xlane.f32.xlu0 %v73_v5  ;;  %p193_p12 = scmp.lt.s32.totalorder %s191_s21, %s187_s20 }
  0x3c   :  { %p194_p13 = por %p193_p12, %p192_p11 }
  0x3d   :  { %v82_v12 = vld [vmem:[#allocation2] sm:$0xff] }
  0x3e   :  { %77 = vadd.xlane.f32.xlu0 %v76_v6  ;;  %p195_p0 = pnand %p194_p13, %p188_p10 }
  0xc7   :  { %v75_v8 = vpop.xlane.xlu0 %74 }
  0xcb   :  { %v78_v9 = vpop.xlane.xlu0 %77 }
  0xcc   :  { %v79_v10 = vsub.f32 %v75_v8, %v78_v9 }
  0xce   :  { %v80_v11 = vadd.f32 10.0, %v79_v10 }
  0xd0   :  { %v81_v13 = vmax.f32 %v80_v11, 0.0 }
  0xd2   :  { %v83_v14 = vadd.f32 %v82_v12, %v81_v13 }
  0xd4   :  { %85 = vst.msk [vmem:[#allocation2] sm:$0xff] %vm66_vm0, %v83_v14 }
  0xdb   :  { %v89_v15 = vld [vmem:[#allocation2] sm:$0xff] }
  0xdc   :  { %v90_v16 = vsel %vm66_vm0, %v89_v15, 0.0 }
  0xdd   :  { %v91_v17 = vrot.slane %v90_v16, 4 }
  0xdf   :  { %v92_v18 = vadd.f32 %v91_v17, %v90_v16 }
  0xe1   :  { %v93_v19 = vrot.slane %v92_v18, 2 }
  0xe3   :  { %v94_v20 = vadd.f32 %v93_v19, %v92_v18 }
  0xe5   :  { %v95_v21 = vrot.slane %v94_v20, 1 }
  0xe7   :  { %v96_v22 = vadd.f32 %v95_v21, %v94_v20 }
  0xe9   :  { %v97_v23 = vmul.f32 0.125, %v96_v22 }
  0xeb   :  { %99 = vst.msk [vmem:[#allocation9] sm:$0x1] %vm98_vm1, %v97_v23 }
  0xec   :  { %198 = shalt.err (!%p195_p0)
}
  0xed   :  { %s199_s24 = scalar_lea.hbm %s291_s3, 16 }
  0xee   :  { %p200_p1 = scmp.ne.s32.totalorder %s291_s3, %s199_s24  ;;  %p203_p2 = scmp.lt.u32.totalorder %s199_s24, %s291_s3 }
  0xf0   :  { %p205_p3 = pnand %p203_p2, %p200_p1 }
  0xf2   :  { %208 = shalt.err (!%p205_p3)
}
  0xf3   :  { %109 = dma.vmem_to_hbm [thread:$0]  %s107_s19, 16, %s291_s3, [#allocation5]  }
  0xf4   :  { %213 = dma.done.wait [#allocation5], 16  }
  0xf5   :  { %214 = vsyncadd [#allocation5], 4294967280 }
  0xf6   :  { %113 = vsyncpa [#allocation4], 1 }
  0xf7   :  { %114 = vsyncpa [#allocation7], 1 }
  0xf8   :  { %115 = vsyncpa [#allocation5], 1 }

</bundles_post_ra>
